<compile_context>
chip_gen: v5e
topology: v5e:2x2
jax: 0.10.0
libtpu: 0.0.40
codegen_flags: <defaults>
</compile_context>

<pallas_src>
import functools

import jax
import jax.numpy as jnp
from jax import lax
from jax.experimental import pallas as pl
from jax.experimental.pallas import tpu as pltpu


def _sdpa_kernel(q_ref, k_ref, v_ref, m_ref, o_ref, acc_ref, den_ref, *, scale):
    # q_ref: (tq, d_k)   k_ref: (tk, d_k)   v_ref: (tk, d_v)
    # m_ref: (1, tk)     o_ref: (tq, d_v)
    # acc_ref: (tq, d_v) f32 scratch   den_ref: (tq, 1) f32 scratch
    ki = pl.program_id(2)

    @pl.when(ki == 0)
    def _init():
        acc_ref[...] = jnp.zeros_like(acc_ref)
        den_ref[...] = jnp.zeros_like(den_ref)

    q = q_ref[...]
    k = k_ref[...]
    v = v_ref[...]

    # Fold 1/sqrt(d_k) into Q (cheap: tq*d_k elements, keeps native dtype).
    qs = q * jnp.asarray(scale, dtype=q.dtype)

    # Q @ K^T without materializing a transposed K tile: contract d_k vs d_k.
    s = lax.dot_general(
        qs, k,
        dimension_numbers=(((1,), (1,)), ((), ())),
        preferred_element_type=jnp.float32,
    )  # (tq, tk) f32

    # exp (unstabilized, matching the reference), then mask broadcast over rows.
    p = jnp.exp(s)
    p = p * m_ref[...].astype(jnp.float32)  # (1, tk) -> (tq, tk)

    # Streamed accumulation of denominator and unnormalized context.
    den_ref[...] += jnp.sum(p, axis=-1, keepdims=True)
    acc_ref[...] += jnp.dot(
        p.astype(v.dtype), v, preferred_element_type=jnp.float32
    )

    @pl.when(ki == pl.num_programs(2) - 1)
    def _finalize():
        inv = 1.0 / (den_ref[...] + 1e-8)
        o_ref[...] = (acc_ref[...] * inv).astype(o_ref.dtype)


def _pick_tile(n, pref, align):
    """Largest divisor of n that is <= pref and a multiple of `align`;
    falls back to the full extent n if none exists (or n <= pref)."""
    if n <= pref:
        return n
    t = (pref // align) * align
    while t >= align:
        if n % t == 0:
            return t
        t -= align
    return n


def scaled_dot_product_attention(Q, K, V, attn_mask=None, *, q_tile=256, k_tile=512):
    """Q, K: (B, H, N, d_k); V: (B, H, N, d_v); attn_mask: (B, H, N) or None.
    Returns: (B, H, N, d_v)."""
    B, H, N, d_k = Q.shape
    d_v = V.shape[-1]
    G = B * H

    if attn_mask is None:
        attn_mask = jnp.ones((B, H, N), dtype=Q.dtype)

    # Flatten (B, H) into a single parallel grid axis.
    Qf = Q.reshape(G, N, d_k)
    Kf = K.reshape(G, N, d_k)
    Vf = V.reshape(G, N, d_v)
    Mf = attn_mask.reshape(G, 1, N)

    # Query tile must be a multiple of 8 (sublane); key tile a multiple of 128
    # (lane, because the mask tile is (1, tk)); otherwise use the full extent.
    tq = _pick_tile(N, q_tile, 8)
    tk = _pick_tile(N, k_tile, 128)
    nq = N // tq
    nk = N // tk

    scale = 1.0 / float(d_k) ** 0.5
    sq = pl.Squeezed()
    kernel = functools.partial(_sdpa_kernel, scale=scale)

    out = pl.pallas_call(
        kernel,
        out_shape=jax.ShapeDtypeStruct((G, N, d_v), Q.dtype),
        grid=(G, nq, nk),
        in_specs=[
            pl.BlockSpec((sq, tq, d_k), lambda g, qi, ki: (g, qi, 0)),  # Q
            pl.BlockSpec((sq, tk, d_k), lambda g, qi, ki: (g, ki, 0)),  # K
            pl.BlockSpec((sq, tk, d_v), lambda g, qi, ki: (g, ki, 0)),  # V
            pl.BlockSpec((sq, 1, tk), lambda g, qi, ki: (g, 0, ki)),    # mask
        ],
        out_specs=pl.BlockSpec((sq, tq, d_v), lambda g, qi, ki: (g, qi, 0)),
        scratch_shapes=[
            pltpu.VMEM((tq, d_v), jnp.float32),  # unnormalized context accumulator
            pltpu.VMEM((tq, 1), jnp.float32),    # row-sum denominator accumulator
        ],
        compiler_params=pltpu.CompilerParams(
            dimension_semantics=("parallel", "parallel", "arbitrary"),
        ),
    )(Qf, Kf, Vf, Mf)

    return out.reshape(B, H, N, d_v)


def _reference(Q, K, V, attn_mask=None):
    d_k = Q.shape[-1]
    scores = jnp.einsum("bhqd,bhkd->bhqk", Q, K) / jnp.sqrt(jnp.float32(d_k))
    scores = jnp.exp(scores)
    if attn_mask is not None:
        scores = scores * attn_mask[:, :, None, :]
    attn = scores / (jnp.sum(scores, axis=-1, keepdims=True) + 1e-8)
    return jnp.einsum("bhqk,bhkd->bhqd", attn, V)


if __name__ == "__main__":
    # --- Test 1: small shape matching the module's typical usage -------------
    B, H, N, d_k, d_v = 2, 4, 8, 32, 32
    key = jax.random.PRNGKey(0)
    kq, kk, kv, km = jax.random.split(key, 4)
    Q = jax.random.normal(kq, (B, H, N, d_k), dtype=jnp.float32)
    K = jax.random.normal(kk, (B, H, N, d_k), dtype=jnp.float32)
    V = jax.random.normal(kv, (B, H, N, d_v), dtype=jnp.float32)
    attn_mask = (jax.random.uniform(km, (B, H, N)) > 0.3).astype(jnp.float32)

    out = scaled_dot_product_attention(Q, K, V, attn_mask)
    out = jax.block_until_ready(out)
    ref = _reference(Q, K, V, attn_mask)
    assert out.shape == (B, H, N, d_v)
    assert jnp.allclose(out, ref, atol=2e-5, rtol=2e-5)

    # --- Test 2: larger N to exercise the query/key tiling + streaming path --
    B2, H2, N2, dk2, dv2 = 1, 2, 1024, 32, 64
    k2 = jax.random.PRNGKey(0)
    kq2, kk2, kv2, km2 = jax.random.split(k2, 4)
    Q2 = jax.random.normal(kq2, (B2, H2, N2, dk2), dtype=jnp.float32)
    K2 = jax.random.normal(kk2, (B2, H2, N2, dk2), dtype=jnp.float32)
    V2 = jax.random.normal(kv2, (B2, H2, N2, dv2), dtype=jnp.float32)
    mask2 = (jax.random.uniform(km2, (B2, H2, N2)) > 0.3).astype(jnp.float32)

    out2 = scaled_dot_product_attention(Q2, K2, V2, mask2)
    out2 = jax.block_until_ready(out2)
    ref2 = _reference(Q2, K2, V2, mask2)
    assert out2.shape == (B2, H2, N2, dv2)
    assert jnp.allclose(out2, ref2, atol=2e-3, rtol=2e-3)

    print("KERNEL_OK")
</pallas_src>

<mosaic_0001>
module attributes {stable_mosaic.version = 11 : i64} {
  func.func @_sdpa_kernel(%arg0: i32, %arg1: i32, %arg2: i32, %arg3: memref<1x8x32xf32, #tpu.memory_space<vmem>>, %arg4: memref<1x8x32xf32, #tpu.memory_space<vmem>>, %arg5: memref<1x8x32xf32, #tpu.memory_space<vmem>>, %arg6: memref<1x1x8xf32, #tpu.memory_space<vmem>>, %arg7: memref<1x8x32xf32, #tpu.memory_space<vmem>>, %arg8: memref<8x32xf32, #tpu.memory_space<vmem>>, %arg9: memref<8x1xf32, #tpu.memory_space<vmem>>) attributes {dimension_semantics = [#tpu.dimension_semantics<parallel>, #tpu.dimension_semantics<parallel>, #tpu.dimension_semantics<arbitrary>], iteration_bounds = array<i64: 8, 1, 1>, scalar_prefetch = 0 : i64, scratch_operands = 2 : i64, tpu.core_type = #tpu.core_type<tc>, window_params = [{transform_indices = @transform_0, window_bounds = array<i64: 1, 8, 32>}, {transform_indices = @transform_1, window_bounds = array<i64: 1, 8, 32>}, {transform_indices = @transform_2, window_bounds = array<i64: 1, 8, 32>}, {transform_indices = @transform_3, window_bounds = array<i64: 1, 1, 8>}, {transform_indices = @transform_4, window_bounds = array<i64: 1, 8, 32>}]} {
    %c0_i32 = arith.constant 0 : i32
    %0 = arith.cmpi eq, %arg2, %c0_i32 : i32
    %1 = arith.extui %0 : i1 to i32
    %c0_i32_0 = arith.constant 0 : i32
    %2 = arith.cmpi ne, %1, %c0_i32_0 : i32
    scf.if %2 {
      %cst_25 = arith.constant 0.000000e+00 : f32
      %29 = vector.broadcast %cst_25 : f32 to vector<8x32xf32>
      %c0_26 = arith.constant 0 : index
      %c0_27 = arith.constant 0 : index
      %30 = vector.load %arg8[%c0_26, %c0_27] : memref<8x32xf32, #tpu.memory_space<vmem>>, vector<8x32xf32>
      tpu.vector_store %arg8[%c0_26, %c0_27], %29 {strides = array<i32>} : memref<8x32xf32, #tpu.memory_space<vmem>>, vector<8x32xf32>,
      %cst_28 = arith.constant 0.000000e+00 : f32
      %31 = vector.broadcast %cst_28 : f32 to vector<8x1xf32>
      %c0_29 = arith.constant 0 : index
      %c0_30 = arith.constant 0 : index
      %32 = vector.load %arg9[%c0_29, %c0_30] : memref<8x1xf32, #tpu.memory_space<vmem>>, vector<8x1xf32>
      tpu.vector_store %arg9[%c0_29, %c0_30], %31 {strides = array<i32>} : memref<8x1xf32, #tpu.memory_space<vmem>>, vector<8x1xf32>,
    } else {
    }
    %c0 = arith.constant 0 : index
    %c0_1 = arith.constant 0 : index
    %c0_2 = arith.constant 0 : index
    %3 = vector.load %arg3[%c0, %c0_1, %c0_2] : memref<1x8x32xf32, #tpu.memory_space<vmem>>, vector<1x8x32xf32>
    %4 = vector.shape_cast %3 : vector<1x8x32xf32> to vector<8x32xf32>
    %c0_3 = arith.constant 0 : index
    %c0_4 = arith.constant 0 : index
    %c0_5 = arith.constant 0 : index
    %5 = vector.load %arg4[%c0_3, %c0_4, %c0_5] : memref<1x8x32xf32, #tpu.memory_space<vmem>>, vector<1x8x32xf32>
    %6 = vector.shape_cast %5 : vector<1x8x32xf32> to vector<8x32xf32>
    %c0_6 = arith.constant 0 : index
    %c0_7 = arith.constant 0 : index
    %c0_8 = arith.constant 0 : index
    %7 = vector.load %arg5[%c0_6, %c0_7, %c0_8] : memref<1x8x32xf32, #tpu.memory_space<vmem>>, vector<1x8x32xf32>
    %8 = vector.shape_cast %7 : vector<1x8x32xf32> to vector<8x32xf32>
    %cst = arith.constant 0.176776692 : f32
    %9 = vector.broadcast %cst : f32 to vector<8x32xf32>
    %10 = arith.mulf %4, %9 : vector<8x32xf32>
    %cst_9 = arith.constant dense<0.000000e+00> : vector<8x8xf32>
    %11 = tpu.matmul %10, %6, %cst_9 {dimension_numbers = #tpu.dot_dimension_numbers<[1], [1], [0], [0], [0, 0, 1, 0], [], []>} : vector<8x32xf32>, vector<8x32xf32>, vector<8x8xf32> -> vector<8x8xf32>
    %12 = math.exp %11 : vector<8x8xf32>
    %c0_10 = arith.constant 0 : index
    %c0_11 = arith.constant 0 : index
    %c0_12 = arith.constant 0 : index
    %13 = vector.load %arg6[%c0_10, %c0_11, %c0_12] : memref<1x1x8xf32, #tpu.memory_space<vmem>>, vector<1x1x8xf32>
    %14 = vector.shape_cast %13 : vector<1x1x8xf32> to vector<1x8xf32>
    %15 = vector.broadcast %14 : vector<1x8xf32> to vector<8x8xf32>
    %16 = arith.mulf %12, %15 : vector<8x8xf32>
    %c0_13 = arith.constant 0 : index
    %c0_14 = arith.constant 0 : index
    %17 = vector.load %arg9[%c0_13, %c0_14] : memref<8x1xf32, #tpu.memory_space<vmem>>, vector<8x1xf32>
    %cst_15 = arith.constant dense<0.000000e+00> : vector<8xf32>
    %18 = vector.multi_reduction <add>, %16, %cst_15 [1] : vector<8x8xf32> to vector<8xf32>
    %19 = vector.shape_cast %18 : vector<8xf32> to vector<8x1xf32>
    %20 = arith.addf %17, %19 : vector<8x1xf32>
    %c0_16 = arith.constant 0 : index
    %c0_17 = arith.constant 0 : index
    %21 = vector.load %arg9[%c0_16, %c0_17] : memref<8x1xf32, #tpu.memory_space<vmem>>, vector<8x1xf32>
    tpu.vector_store %arg9[%c0_16, %c0_17], %20 {strides = array<i32>} : memref<8x1xf32, #tpu.memory_space<vmem>>, vector<8x1xf32>,
    %c0_18 = arith.constant 0 : index
    %c0_19 = arith.constant 0 : index
    %22 = vector.load %arg8[%c0_18, %c0_19] : memref<8x32xf32, #tpu.memory_space<vmem>>, vector<8x32xf32>
    %cst_20 = arith.constant dense<0.000000e+00> : vector<8x32xf32>
    %23 = tpu.matmul %16, %8, %cst_20 {dimension_numbers = #tpu.dot_dimension_numbers<[1], [0], [0], [1], [0, 0, 1, 1], [], []>} : vector<8x8xf32>, vector<8x32xf32>, vector<8x32xf32> -> vector<8x32xf32>
    %24 = arith.addf %22, %23 : vector<8x32xf32>
    %c0_21 = arith.constant 0 : index
    %c0_22 = arith.constant 0 : index
    %25 = vector.load %arg8[%c0_21, %c0_22] : memref<8x32xf32, #tpu.memory_space<vmem>>, vector<8x32xf32>
    tpu.vector_store %arg8[%c0_21, %c0_22], %24 {strides = array<i32>} : memref<8x32xf32, #tpu.memory_space<vmem>>, vector<8x32xf32>,
    %c0_i32_23 = arith.constant 0 : i32
    %26 = arith.cmpi eq, %arg2, %c0_i32_23 : i32
    %27 = arith.extui %26 : i1 to i32
    %c0_i32_24 = arith.constant 0 : i32
    %28 = arith.cmpi ne, %27, %c0_i32_24 : i32
    scf.if %28 {
      %c0_25 = arith.constant 0 : index
      %c0_26 = arith.constant 0 : index
      %29 = vector.load %arg9[%c0_25, %c0_26] : memref<8x1xf32, #tpu.memory_space<vmem>>, vector<8x1xf32>
      %cst_27 = arith.constant 9.99999993E-9 : f32
      %30 = vector.broadcast %cst_27 : f32 to vector<8x1xf32>
      %31 = arith.addf %29, %30 : vector<8x1xf32>
      %cst_28 = arith.constant 1.000000e+00 : f32
      %32 = vector.broadcast %cst_28 : f32 to vector<8x1xf32>
      %33 = arith.divf %32, %31 : vector<8x1xf32>
      %c0_29 = arith.constant 0 : index
      %c0_30 = arith.constant 0 : index
      %34 = vector.load %arg8[%c0_29, %c0_30] : memref<8x32xf32, #tpu.memory_space<vmem>>, vector<8x32xf32>
      %35 = vector.broadcast %33 : vector<8x1xf32> to vector<8x32xf32>
      %36 = arith.mulf %34, %35 : vector<8x32xf32>
      %c0_31 = arith.constant 0 : index
      %c0_32 = arith.constant 0 : index
      %c0_33 = arith.constant 0 : index
      %37 = vector.load %arg7[%c0_31, %c0_32, %c0_33] : memref<1x8x32xf32, #tpu.memory_space<vmem>>, vector<1x8x32xf32>
      %38 = vector.shape_cast %37 : vector<1x8x32xf32> to vector<8x32xf32>
      %39 = vector.shape_cast %36 : vector<8x32xf32> to vector<1x8x32xf32>
      tpu.vector_store %arg7[%c0_31, %c0_32, %c0_33], %39 {strides = array<i32>} : memref<1x8x32xf32, #tpu.memory_space<vmem>>, vector<1x8x32xf32>,
    } else {
    }
    return
  }
  func.func @transform_0(%arg0: i32, %arg1: i32, %arg2: i32) -> (i32, i32, i32) {
    %c0_i32 = arith.constant 0 : i32
    %c0_i32_0 = arith.constant 0 : i32
    return %arg0, %arg1, %c0_i32 : i32, i32, i32
  }
  func.func @transform_1(%arg0: i32, %arg1: i32, %arg2: i32) -> (i32, i32, i32) {
    %c0_i32 = arith.constant 0 : i32
    %c0_i32_0 = arith.constant 0 : i32
    return %arg0, %arg2, %c0_i32 : i32, i32, i32
  }
  func.func @transform_2(%arg0: i32, %arg1: i32, %arg2: i32) -> (i32, i32, i32) {
    %c0_i32 = arith.constant 0 : i32
    %c0_i32_0 = arith.constant 0 : i32
    return %arg0, %arg2, %c0_i32 : i32, i32, i32
  }
  func.func @transform_3(%arg0: i32, %arg1: i32, %arg2: i32) -> (i32, i32, i32) {
    %c0_i32 = arith.constant 0 : i32
    %c0_i32_0 = arith.constant 0 : i32
    return %arg0, %c0_i32, %arg2 : i32, i32, i32
  }
  func.func @transform_4(%arg0: i32, %arg1: i32, %arg2: i32) -> (i32, i32, i32) {
    %c0_i32 = arith.constant 0 : i32
    %c0_i32_0 = arith.constant 0 : i32
    return %arg0, %arg1, %c0_i32 : i32, i32, i32
  }
}

</mosaic_0001>

<bundles_post_ra>
// kernel: tpu_custom_call.1
= control target key start
LH: loop header
LB: loop body
LE: loop exit
PB: predicated region body
PF: predicated region fallthrough
CT: control target
= control target key end

     0   :  { %s1158_s0 = inlined_call_operand.hbm [shape: f32[8,8,32], index: 0, kind: input, shape index: {}]   ;;  %s1159_s1 = inlined_call_operand.hbm [shape: f32[8,8,32], index: 1, kind: input, shape index: {}]   ;;  %s1160_s2 = inlined_call_operand.hbm [shape: f32[8,8,32], index: 2, kind: input, shape index: {}]   ;;  %s1161_s3 = inlined_call_operand.hbm [shape: f32[8,1,8], index: 3, kind: input, shape index: {}]   ;;  %s1162_s4 = inlined_call_operand.hbm [shape: f32[8,8,32], index: 4, kind: output, shape index: {}]  }
   0x1   :  { %1167 = sst [smem:[#allocation22_spill]] %s1158_s0 }
   0x2   :  { %1168 = sst [smem:[#allocation23_spill]] %s1159_s1 }
   0x3   :  { %9 = vsyncpa [#allocation5], 0 }
   0x4   :  { %11 = vsyncpa [#allocation5 + $0x1], 0 }
   0x5   :  { %12 = vsyncpa [#allocation8], 0 }
   0x6   :  { %14 = vsyncpa [#allocation8 + $0x1], 0 }
   0x7   :  { %15 = vsyncpa [#allocation11], 0 }
   0x8   :  { %17 = vsyncpa [#allocation11 + $0x1], 0 }
   0x9   :  { %18 = vsyncpa [#allocation6], 0 }
   0xa   :  { %20 = vsyncpa [#allocation6 + $0x1], 0  ;;  %s977_s15 = smov 0   ;;  %s979_s16 = smov 0  }
   0xb   :  { %s981_s17 = smov 0   ;;  %s983_s18 = smov 0  }
   0xc   :  { %s985_s19 = smov 0   ;;  %s987_s20 = smov 0  }
   0xd LB: > { %1169 = sst [smem:[#allocation17_spill]] %s928_s15  ;;  %s1008_s21 = sadd.s32 4294967295, %s948_s20   ;;  %s948_s20 = sphi %s987_s20, %s26_s20   ;;  %s944_s19 = sphi %s985_s19, %s1190_s19   ;;  %s940_s18 = sphi %s983_s18, %s1189_s18   ;;  %s936_s17 = sphi %s981_s17, %s1185_s17   ;;  %s932_s16 = sphi %s979_s16, %s1188_s16   ;;  %s928_s15 = sphi %s977_s15, %s1187_s15  }
   0xe   : > { %1170 = sst [smem:[#allocation18_spill]] %s936_s17  ;;  %s632_s22 = sadd.s32 4294967294, %s948_s20  }
   0xf   : > { %s45_s23 = sadd.s32 1, %s944_s19  ;;  %s54_s24 = sadd.s32 1, %s936_s17 }
  0x10   : > { %p47_p0 = scmp.ge.s32.totalorder %s45_s23, 8  ;;  %p61_p1 = scmp.ne.s32.totalorder %s936_s17, %s932_s16 }
  0x11   : > { %p62_p2 = scmp.eq.s32.totalorder %s948_s20, 0  ;;  %p67_p3 = scmp.ne.s32.totalorder %s932_s16, %s928_s15 }
  0x12   : > { %s1192_s23 = smov (%p47_p0, %s45_s23), 0  ;;  %p68_p5 = scmp.eq.s32.totalorder %s1008_s21, 0 }
  0x13   : > { %1171 = sst [smem:[#allocation19_spill]] %s1192_s23  ;;  %p1020_p4 = por %p62_p2, %p61_p1 }
  0x14   : > { %s49_s26 = ssub.s32 %s944_s19, %s1192_s23  ;;  %p177_p6 = scmp.eq.s32.totalorder %s1008_s21, 7 }
  0x15   : > { %p52_p7 = scmp.eq.s32.totalorder %s49_s26, 0  ;;  %p1028_p8 = por %p68_p5, %p67_p3 }
  0x16   : > { %p1032_p9 = por %p177_p6, %p61_p1  ;;  %p183_p10 = scmp.eq.s32.totalorder %s632_s22, 7 }
  0x17   : > { %s1037_s29 = scalar_select %p52_p7, %s936_s17, %s54_s24  }
  0x18   : > { %p1039_p11 = por %p183_p10, %p67_p3  ;;  %p680_p12 = scmp.lt.s32.totalorder %s948_s20, 8 }
  0x19   : > { %1175 = sst [smem:[#allocation20_spill]] %s1037_s29  ;;  %s1045_s5 = sand.u32 1, %s936_s17  }
  0x1a   : > { %s1176_s30 = scalar_select %p1039_p11, 1, 0 }
  0x1b   : > { %s635_s6 = sshll.u32 %s1045_s5, 3  ;;  %s636_s7 = sshll.u32 %s944_s19, 3 }
  0x1c   : > { %1177 = sst [smem:[#allocation21_spill]] %s1176_s30  ;;  %p1051_p13 = pnand %p680_p12, %p1020_p4 }
  0x1d   : > { %s223_s9 = sand.u32 1, %s948_s20   ;;  %s1179_s1 = sld [smem:[#allocation23_spill]] }
  0x1e   : > { %s227_s14 = scalar_lea.vmem [#allocation7], %s635_s6  ;;  %s224_s24 = scalar_lea.sflag [#allocation8], %s223_s9 }
  0x1f   : > { %s236_s22 = sshll.u32 %s227_s14, 4  ;;  %p641_p0 = scmp.ge.s32.totalorder %s948_s20, 1  ;;  %s237_s22 = int_to_ptr.vmem [resolvable:$true] %s236_s22 }
  0x20   : > { %p279_p1 = scmp.lt.s32.totalorder %s948_s20, 9  ;;  %s1181_s0 = sld [smem:[#allocation22_spill]] }
  0x21   : > { %s207_s14 = scalar_lea.vmem [#allocation4], %s635_s6  ;;  %s204_s9 = scalar_lea.sflag [#allocation5], %s1045_s5 }
  0x22   : > { %p1063_p2 = pnand %p641_p0, %p279_p1  ;;  %s252_s23 = scalar_lea.hbm %s1160_s2, %s636_s7 }
  0x23   : > { %s232_s12 = scalar_lea.hbm %s1179_s1, %s636_s7  ;;  %s216_s1 = sshll.u32 %s207_s14, 4  ;;  %s217_s1 = int_to_ptr.vmem [resolvable:$true] %s216_s1 }
  0x24   : > { %s234_s13 = sshll.u32 %s232_s12, 4  ;;  %s254_s29 = sshll.u32 %s252_s23, 4  ;;  %s235_s13 = int_to_ptr.hbm [resolvable:$true] %s234_s13  ;;  %s255_s29 = int_to_ptr.hbm [resolvable:$true] %s254_s29 }
  0x25   : > { %669 = dma.hbm_to_vmem [thread:$0]  (!%p1051_p13), %s235_s13, 128, %s237_s22, %s224_s24  }
  0x26   : > { %s212_s11 = scalar_lea.hbm %s1181_s0, %s636_s7  ;;  %s247_s17 = scalar_lea.vmem [#allocation9], %s635_s6 }
  0x27   : > { %s214_s12 = sshll.u32 %s212_s11, 4  ;;  %s256_s26 = sshll.u32 %s247_s17, 4  ;;  %s215_s12 = int_to_ptr.hbm [resolvable:$true] %s214_s12  ;;  %s257_s26 = int_to_ptr.vmem [resolvable:$true] %s256_s26 }
  0x28   : > { %666 = dma.hbm_to_vmem [thread:$0]  (!%p1051_p13), %s215_s12, 128, %s217_s1, %s204_s9  }
  0x29   : > { %672 = dma.hbm_to_vmem [thread:$0]  (!%p1051_p13), %s255_s29, 128, %s257_s26, %s224_s24  }
  0x2a   : > { %s270_s14 = scalar_lea.hbm %s1161_s3, %s944_s19  ;;  %s266_s0 = scalar_lea.vmem [#allocation10], %s1045_s5 }
  0x2b   : > { %s274_s30 = sshll.u32 %s266_s0, 4  ;;  %s272_s15 = sshll.u32 %s270_s14, 4  ;;  %s275_s30 = int_to_ptr.vmem [resolvable:$true] %s274_s30  ;;  %s273_s15 = int_to_ptr.hbm [resolvable:$true] %s272_s15 }
  0x2c   : > { %s264_s1 = scalar_lea.sflag [#allocation11], %s1045_s5  ;;  %283 = sbr.rel (%p1063_p2) target bundleno = 463 (0x1cf), region = 36 }
  0x2d   : > { %675 = dma.hbm_to_vmem [thread:$0]  (!%p1051_p13), %s273_s15, 16, %s275_s30, %s264_s1  }
  0x2e   : > { %s1089_s17 = sand.u32 (!%p1063_p2), 1, %s932_s16  }
  0x2f   : > { %s1092_s23 = sshll.u32 (!%p1063_p2), %s1089_s17, 3  ;;  %s286_s29 = scalar_lea.sflag (!%p1063_p2), [#allocation5], %s1089_s17 }
  0x30   : > { %s289_s0 = scalar_lea.vmem (!%p1063_p2), [#allocation4], %s1092_s23 }
  0x31   : > { %911 = dma.done.wait (%p1028_p8), %s286_s29, 128  }
  0x32   : > { %913 = vsyncadd (%p1028_p8), %s286_s29, 4294967168  ;;  %s295_s15 = sand.u32 1, %s1008_s21   ;;  %s299_s5 = scalar_lea.vmem [#allocation7], %s1092_s23 }
  0x33   : > { %s296_s30 = scalar_lea.sflag [#allocation8], %s295_s15 }
  0x34   : > { %915 = dma.done.wait (%p1028_p8), %s296_s30, 256  }
  0x35   : > { %917 = vsyncadd (%p1028_p8), %s296_s30, 4294967040  ;;  %s309_s6 = scalar_lea.vmem [#allocation9], %s1092_s23  ;;  %s316_s7 = scalar_lea.sflag [#allocation11], %s1089_s17 }
  0x36   : > { %s318_s8 = scalar_lea.vmem [#allocation10], %s1089_s17 }
  0x37   : > { %919 = dma.done.wait (%p1028_p8), %s316_s7, 16  }
  0x38   : > { %921 = vsyncadd (%p1028_p8), %s316_s7, 4294967280  ;;  %vm362_vm0 = vcmask 261120   ;;  %v950_v0 = vmov 0.0   ;;  %v367_v1 = vld [vmem:[%s299_s5] sm:$0xff]  ;;  %v366_v2 = vld [vmem:[%s289_s0] sm:$0xff]  ;;  %vm364_vm1 = vcmask 7168  }
  0x39   : > { %363 = vst.msk [vmem:[#allocation2] sm:$0xff] %vm362_vm0, %v950_v0  ;;  %646 = vmatpush.xpose.msk.msra.mxu0 %vm362_vm0, %v367_v1  ;;  %v369_v3 = vmul.f32 0.17677669, %v366_v2  ;;  %v368_v4 = vld [vmem:[%s309_s6] sm:$0xff]  ;;  %v733_v7 = vld [vmem:[%s318_s8] ss:$0 sm:$0xff] }
  0x3a   : > { %431 = vmatpush.msra.mxu1 %v368_v4  ;;  %365 = vst.msk [vmem:[#allocation3] sm:$0xff] %vm364_vm1, %v950_v0  ;;  %vm405_vm2 = vcmask 64512   ;;  %v951_v11 = vmov 0   ;;  %s650_s21 = sshll.u32 %s940_s18, 3  ;;  %s357_s12 = scalar_lea.vmem [#allocation12], %s1092_s23 }
  0x3b   : > { %732 = vset.pattern.permute.xlu0 %v951_v11  ;;  %s478_s25 = scalar_lea.hbm %s1162_s4, %s650_s21  ;;  %s480_s9 = sshll.u32 %s357_s12, 4  ;;  %s481_s9 = int_to_ptr.vmem [resolvable:$true] %s480_s9 }
  0x3c   : > { %647 = vmatmul.msk.f32.vlgmr.msra.gmra.mxu0 %vm362_vm0, %v369_v3  ;;  %s482_s13 = sshll.u32 %s478_s25, 4  ;;  %s467_s22 = scalar_lea.sflag [#allocation6], %s1089_s17  ;;  %s483_s13 = int_to_ptr.hbm [resolvable:$true] %s482_s13 }
  0x3d   : > { %s872_s26 = sshra.s32 %s483_s13, 4  ;;  %s878_s14 = scalar_lea.hbm %s1162_s4, 64  ;;  %s873_s26 = int_to_ptr.hbm [resolvable:$true] %s872_s26 }
  0x3e   : > { %s874_s10 = scalar_lea.hbm %s873_s26, 8  ;;  %p879_p6 = scmp.lt.s32.totalorder %s873_s26, %s1162_s4 }
  0x3f   : > { %p875_p3 = scmp.ne.s32.totalorder %s873_s26, %s874_s10  ;;  %p880_p7 = scmp.lt.s32.totalorder %s878_s14, %s874_s10 }
  0x40   : > { %v412_v15 = vld [vmem:[#allocation2] sm:$0xff] }
  0x41   : > { %v404_v12 = vld [vmem:[#allocation3] sm:$0xff]  ;;  %p876_p4 = pnand %p875_p3, %p1032_p9  ;;  %p881_p8 = por %p880_p7, %p879_p6 }
  0x43   : > { %p877_p5 = pneg %p876_p4 }
  0x45   : > { %p882_p10 = pnand %p881_p8, %p877_p5 }
  0xb9   : > { %v394_v5 = vpop.f32.mrf.mxu0 }
  0xba   : > { %v397_v6 = vmul.f32 1.442695, %v394_v5 }
  0xbc   : > { %734 = vpow2.f32 %v397_v6 }
  0xc2   : > { %v735_v8 = vpop.eup %734 }
  0xc3   : > { %v403_v9 = vmul.f32 %v735_v8, %v733_v7 }
  0xc5   : > { %648 = vmatmul.msk.f32.vlgmr.msra.gmra.mxu1 %vm405_vm2, %v403_v9  ;;  %v406_v10 = vsel %vm405_vm2, %v403_v9, 0.0 }
  0xc6   : > { %407 = vadd.xlane.f32.xlu0 %v406_v10 }
 0x139   : > { %v408_v13 = vpop.xlane.xlu0 %407 }
 0x13a   : > { %v409_v14 = vadd.f32 %v408_v13, %v404_v12 }
 0x13c   : > { %411 = vst.msk [vmem:[#allocation3] sm:$0xff] %vm364_vm1, %v409_v14 }
 0x142   : > { %v433_v16 = vpop.f32.mrf.mxu1 }
 0x143   : > { %v436_v17 = vadd.f32 %v433_v16, %v412_v15  ;;  %v441_v18 = vld [vmem:[#allocation3] sm:$0xff] }
 0x144   : > { %v442_v19 = vadd.f32 1e-08, %v441_v18 }
 0x145   : > { %437 = vst.msk [vmem:[#allocation2] sm:$0xff] %vm362_vm0, %v436_v17 }
 0x146   : > { %736 = vrcp.f32 %v442_v19  ;;  %v454_v23 = vand.u32 2147483648, %v442_v19  ;;  %v452_v25 = vand.u32 2147483647, %v442_v19  ;;  %vm448_vm4 = vweird.f32 %v442_v19 }
 0x148   : > { %v455_v27 = vor.u32 1.1754944e-38, %v454_v23  ;;  %vm453_vm6 = vcmp.eq.f32.partialorder %v452_v25, 8.507059e+37 }
 0x14c   : > { %v737_v20 = vpop.eup %736  ;;  %v458_v31 = vld [vmem:[#allocation2] sm:$0xff] }
 0x14d   : > { %v444_v21 = vmul.f32 %v737_v20, %v442_v19  ;;  %vm449_vm3 = vweird.f32 %v737_v20 }
 0x14e   : > { %vm450_vm5 = vmor %vm448_vm4, %vm449_vm3 }
 0x14f   : > { %v445_v22 = vsub.f32 1.0, %v444_v21 }
 0x151   : > { %v446_v24 = vmul.f32 %v737_v20, %v445_v22 }
 0x153   : > { %v447_v26 = vadd.f32 %v737_v20, %v446_v24 }
 0x155   : > { %v451_v28 = vsel %vm450_vm5, %v737_v20, %v447_v26 }
 0x156   : > { %v456_v29 = vsel %vm453_vm6, %v455_v27, %v451_v28 }
 0x157   : > { %461 = vperm.xlu0 %732, %v456_v29  }
 0x1c9   : > { %v462_v30 = vpop.permute.xlu0 %461 }
 0x1ca   : > { %v464_v32 = vmul.f32 %v462_v30, %v458_v31 }
 0x1cc   : > { %465 = vst.msk [vmem:[%s357_s12] sm:$0xff] %vm362_vm0, %v464_v32 }
 0x1cd   : > { %885 = shalt.err (!%p882_p10)
}
 0x1ce   : > { %661 = dma.vmem_to_hbm [thread:$0]  (%p1032_p9), %s481_s9, 128, %s483_s13, %s467_s22  }
 0x1cf PF: > { %s1182_s17 = sld [smem:[#allocation17_spill]]  ;;  %p681_p12 = scmp.ge.s32.totalorder %s948_s20, 2 }
 0x1d1   : > { %p677_p13 = pnand %p681_p12, %p1039_p11 }
 0x1d3   : > { %p678_p0 = pneg %p677_p13 }
 0x1d5   : > { %s494_s0 = sand.u32 1, %s1182_s17  }
 0x1d6   : > { %s495_s15 = scalar_lea.sflag [#allocation6], %s494_s0 }
 0x1d7   : > { %923 = dma.done.wait (%p678_p0), %s495_s15, 128  }
 0x1d8   : > { %925 = vsyncadd (%p678_p0), %s495_s15, 4294967168  ;;  %s26_s20 = sadd.s32 1, %s948_s20   ;;  %s1184_s30 = sld [smem:[#allocation18_spill]] }
 0x1d9   : > { %p23_p1 = scmp.ge.s32.totalorder %s26_s20, 10   ;;  %s1185_s17 = sld [smem:[#allocation20_spill]] }
 0x1da   : > { %s1186_s28 = sld [smem:[#allocation19_spill]]  ;;  %s1187_s15 = smov %s932_s16 }
 0x1db   : > { %s1189_s18 = smov %s944_s19 }
 0x1dc   :  { %25 = sbr.rel (!%p23_p1) target bundleno = 13 (0xd), region = 126 }
 0x1de   : > { %s1188_s16 = smov %s1184_s30 }
 0x1e0   : > { %s1190_s19 = smov %s1186_s28 }
 0x1e1   :  { %501 = vsyncpa [#allocation5], 1 }
 0x1e2   :  { %503 = vsyncpa [#allocation5 + $0x1], 1 }
 0x1e3   :  { %504 = vsyncpa [#allocation8], 1 }
 0x1e4   :  { %506 = vsyncpa [#allocation8 + $0x1], 1 }
 0x1e5   :  { %507 = vsyncpa [#allocation11], 1 }
 0x1e6   :  { %509 = vsyncpa [#allocation11 + $0x1], 1 }
 0x1e7   :  { %510 = vsyncpa [#allocation6], 1 }
 0x1e8   :  { %512 = vsyncpa [#allocation6 + $0x1], 1 }

</bundles_post_ra>
